<compile_context>
chip_gen: v7x
topology: tpu7x:2x2x1
jax: 0.10.0
libtpu: 0.0.40
codegen_flags: <defaults>
</compile_context>

<pallas_src>
import functools

import jax
import jax.numpy as jnp
from jax.experimental import pallas as pl
from jax.experimental.pallas import tpu as pltpu

EPS = 1e-5  # torch.nn.BatchNorm2d default eps


# -----------------------------------------------------------------------------
# Pallas kernel: conv-as-matmul (channel-major) + 2-pass BN + ReLU + 2x2 maxpool
# -----------------------------------------------------------------------------
def conv_block_kernel(x_ref, w_ref, g_ref, b_ref, o_ref,
                      sum_ref, sq_ref, scale_ref, shift_ref, *, inv_n):
    # x_ref    : [4, K_pad, tp] bf16  transposed im2col, pool-phase-major
    # w_ref    : [Cout, K_pad]  bf16  conv weights, channel-major
    # g_ref    : [Cout, 1]      f32   BN gamma
    # b_ref    : [Cout, 1]      f32   BN beta
    # o_ref    : [Cout, tp]     f32   pooled output tile (lane-dense store)
    # scratch  : per-channel sum / sumsq / folded scale / shift, [Cout, 1] f32
    ph = pl.program_id(0)              # 0 = stats pass, 1 = normalize/pool pass
    t = pl.program_id(1)
    nt = pl.num_programs(1)

    w = w_ref[...]
    # Convolution as 4 phase-wise MXU matmuls (bf16 x bf16 -> f32 accumulate);
    # lane dim of every result is the position tile (tp), fully dense.
    ys = [jnp.dot(w, x_ref[p], preferred_element_type=jnp.float32)
          for p in range(4)]           # each [Cout, tp]

    @pl.when(jnp.logical_and(ph == 0, t == 0))
    def _init():
        sum_ref[...] = jnp.zeros_like(sum_ref)
        sq_ref[...] = jnp.zeros_like(sq_ref)

    @pl.when(ph == 0)
    def _accumulate_stats():
        s = sum(jnp.sum(y, axis=1, keepdims=True) for y in ys)        # [Cout,1]
        q = sum(jnp.sum(y * y, axis=1, keepdims=True) for y in ys)    # [Cout,1]
        sum_ref[...] = sum_ref[...] + s
        sq_ref[...] = sq_ref[...] + q
        # placeholder write (overwritten in pass 1) so no uninitialized VMEM
        # is ever flushed back to HBM
        o_ref[...] = jnp.zeros_like(o_ref)

    @pl.when(jnp.logical_and(ph == 0, t == nt - 1))
    def _finalize_stats():
        mean = sum_ref[...] * inv_n
        var = sq_ref[...] * inv_n - mean * mean        # biased (BN training mode)
        scale = jax.lax.rsqrt(var + EPS) * g_ref[...]  # folded BN affine
        scale_ref[...] = scale
        shift_ref[...] = b_ref[...] - mean * scale

    @pl.when(ph == 1)
    def _normalize_relu_pool():
        scale = scale_ref[...]                         # [Cout, 1]
        shift = shift_ref[...]
        z = [jnp.maximum(y * scale + shift, 0.0) for y in ys]
        # 2x2 / stride-2 max pool = max over the 4 pre-separated pool phases
        o_ref[...] = jnp.maximum(jnp.maximum(z[0], z[1]),
                                 jnp.maximum(z[2], z[3]))


# -----------------------------------------------------------------------------
# Wrapper: layout conversion, padding, transposed (channel-major) im2col
# -----------------------------------------------------------------------------
def _pick_tile(P):
    # Lane-dense position tiles.  Per-tile VMEM ~ 2 bufs * 4 * K_pad * tp * 2B
    # for X plus 2 * Cout * tp * 4B for the output: capped at tp=2048 this is
    # well under 1 MiB, comfortably inside v7x's 64 MiB (and v5e/v6e 128 MiB).
    for tp in (2048, 1024, 512, 256, 128):
        if P % tp == 0:
            return tp
    return P  # tiny problem: single full-width tile


def conv_block_forward(x_nchw, w_oihw, bias, gamma, beta):
    # `bias` is accepted for parity with the PyTorch module but is NOT used:
    # a per-channel constant added before training-mode BatchNorm is
    # mathematically cancelled by the mean subtraction (dead compute).
    del bias
    N, Cin, H, W = x_nchw.shape
    Cout, _, KH, KW = w_oihw.shape
    assert KH == 3 and KW == 3 and H % 2 == 0 and W % 2 == 0
    Ho, Wo = H // 2, W // 2
    K = KH * KW * Cin
    K_pad = ((K + 15) // 16) * 16      # bf16 sublane packing (16 rows / vreg)
    P = N * Ho * Wo                    # pooled output positions
    tp = _pick_tile(P)
    T = P // tp

    # NCHW -> NHWC, zero-pad spatially for 'same' 3x3 conv
    x = jnp.transpose(x_nchw, (0, 2, 3, 1)).astype(jnp.float32)
    xp = jnp.pad(x, ((0, 0), (1, 1), (1, 1), (0, 0)))

    # im2col: patches[n, i, j, (kh, kw, cin)] = xp[n, i + kh, j + kw, cin]
    patches = jnp.stack(
        [xp[:, kh:kh + H, kw:kw + W, :] for kh in range(KH) for kw in range(KW)],
        axis=3,
    ).reshape(N, H, W, K)

    # channel-major, pool-phase-major transposed im2col:
    #   X3[(di, dj), k, (n, ho, wo)]
    p6 = patches.reshape(N, Ho, 2, Wo, 2, K)
    X3 = jnp.transpose(p6, (2, 4, 5, 0, 1, 3)).reshape(4, K, P)
    X3 = jnp.pad(X3, ((0, 0), (0, K_pad - K), (0, 0))).astype(jnp.bfloat16)

    # conv weights OIHW -> [Cout, (kh, kw, cin)], zero-padded K, bf16
    Wt = jnp.transpose(w_oihw, (0, 2, 3, 1)).reshape(Cout, K).astype(jnp.float32)
    Wt = jnp.pad(Wt, ((0, 0), (0, K_pad - K))).astype(jnp.bfloat16)

    g2 = gamma.reshape(Cout, 1).astype(jnp.float32)
    b2 = beta.reshape(Cout, 1).astype(jnp.float32)

    kernel = functools.partial(conv_block_kernel, inv_n=1.0 / float(4 * P))

    out2 = pl.pallas_call(
        kernel,
        out_shape=jax.ShapeDtypeStruct((Cout, P), jnp.float32),
        grid_spec=pltpu.PrefetchScalarGridSpec(
            num_scalar_prefetch=0,
            grid=(2, T),                                   # (pass, position tile)
            in_specs=[
                pl.BlockSpec((4, K_pad, tp), lambda ph, t: (0, 0, t)),
                pl.BlockSpec((Cout, K_pad), lambda ph, t: (0, 0)),
                pl.BlockSpec((Cout, 1), lambda ph, t: (0, 0)),
                pl.BlockSpec((Cout, 1), lambda ph, t: (0, 0)),
            ],
            out_specs=pl.BlockSpec((Cout, tp), lambda ph, t: (0, t)),
            scratch_shapes=[pltpu.VMEM((Cout, 1), jnp.float32)] * 4,
        ),
        compiler_params=pltpu.CompilerParams(
            # pass axis: stats must complete before normalize; tile axis
            # accumulates into shared scratch during pass 0 -> keep sequential.
            dimension_semantics=("arbitrary", "arbitrary")),
    )(X3, Wt, g2, b2)

    # columns of out2 are (n, ho, wo); back to NCHW
    return jnp.transpose(out2.reshape(Cout, N, Ho, Wo), (1, 0, 2, 3))


# -----------------------------------------------------------------------------
# Pure-JAX f32 reference (module semantics, for correctness check only)
# -----------------------------------------------------------------------------
def conv_block_reference(x, w, bias, gamma, beta):
    y = jax.lax.conv_general_dilated(
        x, w, window_strides=(1, 1), padding="SAME",
        dimension_numbers=("NCHW", "OIHW", "NCHW"),
    ) + bias[None, :, None, None]
    mean = y.mean(axis=(0, 2, 3), keepdims=True)
    var = y.var(axis=(0, 2, 3), keepdims=True)  # biased, as in BN training mode
    y = (y - mean) / jnp.sqrt(var + EPS)
    y = y * gamma[None, :, None, None] + beta[None, :, None, None]
    y = jnp.maximum(y, 0.0)
    return jax.lax.reduce_window(
        y, -jnp.inf, jax.lax.max, (1, 1, 2, 2), (1, 1, 2, 2), "VALID"
    )


if __name__ == "__main__":
    # ConvBlock config: layout='cnap', filters=8, kernel_size=3
    N, Cin, H, W = 2, 4, 16, 16
    Cout = 8

    key = jax.random.PRNGKey(0)
    kx, kw, kb, kg, kbe = jax.random.split(key, 5)
    x = jax.random.normal(kx, (N, Cin, H, W), dtype=jnp.float32)
    w = 0.1 * jax.random.normal(kw, (Cout, Cin, 3, 3), dtype=jnp.float32)
    bias = 0.1 * jax.random.normal(kb, (Cout,), dtype=jnp.float32)
    gamma = 1.0 + 0.1 * jax.random.normal(kg, (Cout,), dtype=jnp.float32)
    beta = 0.1 * jax.random.normal(kbe, (Cout,), dtype=jnp.float32)

    out = conv_block_forward(x, w, bias, gamma, beta)
    out = jax.block_until_ready(out)

    ref = conv_block_reference(x, w, bias, gamma, beta)
    assert out.shape == (N, Cout, H // 2, W // 2), out.shape
    # bf16 conv operands (f32 accumulation) vs a pure-f32 reference:
    # expected deviation is ~1e-3 on the BN-normalized output.
    err = float(jnp.max(jnp.abs(out - ref)))
    assert err < 3e-2, err

    print("KERNEL_OK")
</pallas_src>

<mosaic_0001>
module attributes {stable_mosaic.version = 11 : i64} {
  func.func @conv_block_kernel(%arg0: i32, %arg1: i32, %arg2: memref<4x48x128xbf16, #tpu.memory_space<vmem>>, %arg3: memref<8x48xbf16, #tpu.memory_space<vmem>>, %arg4: memref<8x1xf32, #tpu.memory_space<vmem>>, %arg5: memref<8x1xf32, #tpu.memory_space<vmem>>, %arg6: memref<8x128xf32, #tpu.memory_space<vmem>>, %arg7: memref<8x1xf32, #tpu.memory_space<vmem>>, %arg8: memref<8x1xf32, #tpu.memory_space<vmem>>, %arg9: memref<8x1xf32, #tpu.memory_space<vmem>>, %arg10: memref<8x1xf32, #tpu.memory_space<vmem>>) attributes {dimension_semantics = [#tpu.dimension_semantics<arbitrary>, #tpu.dimension_semantics<arbitrary>], iteration_bounds = array<i64: 2, 1>, scalar_prefetch = 0 : i64, scratch_operands = 4 : i64, tpu.core_type = #tpu.core_type<tc>, window_params = [{transform_indices = @transform_0, window_bounds = array<i64: 4, 48, 128>}, {pipeline_mode = #tpu.pipeline_mode<synchronous>, transform_indices = @transform_1, window_bounds = array<i64: 8, 48>}, {pipeline_mode = #tpu.pipeline_mode<synchronous>, transform_indices = @transform_2, window_bounds = array<i64: 8, 1>}, {pipeline_mode = #tpu.pipeline_mode<synchronous>, transform_indices = @transform_3, window_bounds = array<i64: 8, 1>}, {transform_indices = @transform_4, window_bounds = array<i64: 8, 128>}]} {
    %c0 = arith.constant 0 : index
    %c0_0 = arith.constant 0 : index
    %0 = vector.load %arg3[%c0, %c0_0] : memref<8x48xbf16, #tpu.memory_space<vmem>>, vector<8x48xbf16>
    %c0_1 = arith.constant 0 : index
    %c0_2 = arith.constant 0 : index
    %c0_3 = arith.constant 0 : index
    %1 = vector.load %arg2[%c0_1, %c0_2, %c0_3] : memref<4x48x128xbf16, #tpu.memory_space<vmem>>, vector<1x48x128xbf16>
    %2 = vector.shape_cast %1 : vector<1x48x128xbf16> to vector<48x128xbf16>
    %cst = arith.constant dense<0.000000e+00> : vector<8x128xf32>
    %3 = tpu.matmul %0, %2, %cst {dimension_numbers = #tpu.dot_dimension_numbers<[1], [0], [0], [1], [0, 0, 1, 1], [], []>} : vector<8x48xbf16>, vector<48x128xbf16>, vector<8x128xf32> -> vector<8x128xf32>
    %c1 = arith.constant 1 : index
    %c0_4 = arith.constant 0 : index
    %c0_5 = arith.constant 0 : index
    %4 = vector.load %arg2[%c1, %c0_4, %c0_5] : memref<4x48x128xbf16, #tpu.memory_space<vmem>>, vector<1x48x128xbf16>
    %5 = vector.shape_cast %4 : vector<1x48x128xbf16> to vector<48x128xbf16>
    %cst_6 = arith.constant dense<0.000000e+00> : vector<8x128xf32>
    %6 = tpu.matmul %0, %5, %cst_6 {dimension_numbers = #tpu.dot_dimension_numbers<[1], [0], [0], [1], [0, 0, 1, 1], [], []>} : vector<8x48xbf16>, vector<48x128xbf16>, vector<8x128xf32> -> vector<8x128xf32>
    %c2 = arith.constant 2 : index
    %c0_7 = arith.constant 0 : index
    %c0_8 = arith.constant 0 : index
    %7 = vector.load %arg2[%c2, %c0_7, %c0_8] : memref<4x48x128xbf16, #tpu.memory_space<vmem>>, vector<1x48x128xbf16>
    %8 = vector.shape_cast %7 : vector<1x48x128xbf16> to vector<48x128xbf16>
    %cst_9 = arith.constant dense<0.000000e+00> : vector<8x128xf32>
    %9 = tpu.matmul %0, %8, %cst_9 {dimension_numbers = #tpu.dot_dimension_numbers<[1], [0], [0], [1], [0, 0, 1, 1], [], []>} : vector<8x48xbf16>, vector<48x128xbf16>, vector<8x128xf32> -> vector<8x128xf32>
    %c3 = arith.constant 3 : index
    %c0_10 = arith.constant 0 : index
    %c0_11 = arith.constant 0 : index
    %10 = vector.load %arg2[%c3, %c0_10, %c0_11] : memref<4x48x128xbf16, #tpu.memory_space<vmem>>, vector<1x48x128xbf16>
    %11 = vector.shape_cast %10 : vector<1x48x128xbf16> to vector<48x128xbf16>
    %cst_12 = arith.constant dense<0.000000e+00> : vector<8x128xf32>
    %12 = tpu.matmul %0, %11, %cst_12 {dimension_numbers = #tpu.dot_dimension_numbers<[1], [0], [0], [1], [0, 0, 1, 1], [], []>} : vector<8x48xbf16>, vector<48x128xbf16>, vector<8x128xf32> -> vector<8x128xf32>
    %c0_i32 = arith.constant 0 : i32
    %13 = arith.cmpi eq, %arg0, %c0_i32 : i32
    %c0_i32_13 = arith.constant 0 : i32
    %14 = arith.cmpi eq, %arg1, %c0_i32_13 : i32
    %15 = arith.andi %13, %14 : i1
    %16 = arith.extui %15 : i1 to i32
    %c0_i32_14 = arith.constant 0 : i32
    %17 = arith.cmpi ne, %16, %c0_i32_14 : i32
    scf.if %17 {
      %cst_21 = arith.constant 0.000000e+00 : f32
      %29 = vector.broadcast %cst_21 : f32 to vector<8x1xf32>
      %c0_22 = arith.constant 0 : index
      %c0_23 = arith.constant 0 : index
      %30 = vector.load %arg7[%c0_22, %c0_23] : memref<8x1xf32, #tpu.memory_space<vmem>>, vector<8x1xf32>
      tpu.vector_store %arg7[%c0_22, %c0_23], %29 {strides = array<i32>} : memref<8x1xf32, #tpu.memory_space<vmem>>, vector<8x1xf32>,
      %cst_24 = arith.constant 0.000000e+00 : f32
      %31 = vector.broadcast %cst_24 : f32 to vector<8x1xf32>
      %c0_25 = arith.constant 0 : index
      %c0_26 = arith.constant 0 : index
      %32 = vector.load %arg8[%c0_25, %c0_26] : memref<8x1xf32, #tpu.memory_space<vmem>>, vector<8x1xf32>
      tpu.vector_store %arg8[%c0_25, %c0_26], %31 {strides = array<i32>} : memref<8x1xf32, #tpu.memory_space<vmem>>, vector<8x1xf32>,
    } else {
    }
    %c0_i32_15 = arith.constant 0 : i32
    %18 = arith.cmpi eq, %arg0, %c0_i32_15 : i32
    %19 = arith.extui %18 : i1 to i32
    %c0_i32_16 = arith.constant 0 : i32
    %20 = arith.cmpi ne, %19, %c0_i32_16 : i32
    scf.if %20 {
      %cst_21 = arith.constant dense<0.000000e+00> : vector<8xf32>
      %29 = vector.multi_reduction <add>, %3, %cst_21 [1] : vector<8x128xf32> to vector<8xf32>
      %30 = vector.shape_cast %29 : vector<8xf32> to vector<8x1xf32>
      %cst_22 = arith.constant 0.000000e+00 : f32
      %31 = vector.broadcast %cst_22 : f32 to vector<8x1xf32>
      %32 = arith.addf %31, %30 : vector<8x1xf32>
      %cst_23 = arith.constant dense<0.000000e+00> : vector<8xf32>
      %33 = vector.multi_reduction <add>, %6, %cst_23 [1] : vector<8x128xf32> to vector<8xf32>
      %34 = vector.shape_cast %33 : vector<8xf32> to vector<8x1xf32>
      %35 = arith.addf %32, %34 : vector<8x1xf32>
      %cst_24 = arith.constant dense<0.000000e+00> : vector<8xf32>
      %36 = vector.multi_reduction <add>, %9, %cst_24 [1] : vector<8x128xf32> to vector<8xf32>
      %37 = vector.shape_cast %36 : vector<8xf32> to vector<8x1xf32>
      %38 = arith.addf %35, %37 : vector<8x1xf32>
      %cst_25 = arith.constant dense<0.000000e+00> : vector<8xf32>
      %39 = vector.multi_reduction <add>, %12, %cst_25 [1] : vector<8x128xf32> to vector<8xf32>
      %40 = vector.shape_cast %39 : vector<8xf32> to vector<8x1xf32>
      %41 = arith.addf %38, %40 : vector<8x1xf32>
      %42 = arith.mulf %3, %3 : vector<8x128xf32>
      %cst_26 = arith.constant dense<0.000000e+00> : vector<8xf32>
      %43 = vector.multi_reduction <add>, %42, %cst_26 [1] : vector<8x128xf32> to vector<8xf32>
      %44 = vector.shape_cast %43 : vector<8xf32> to vector<8x1xf32>
      %cst_27 = arith.constant 0.000000e+00 : f32
      %45 = vector.broadcast %cst_27 : f32 to vector<8x1xf32>
      %46 = arith.addf %45, %44 : vector<8x1xf32>
      %47 = arith.mulf %6, %6 : vector<8x128xf32>
      %cst_28 = arith.constant dense<0.000000e+00> : vector<8xf32>
      %48 = vector.multi_reduction <add>, %47, %cst_28 [1] : vector<8x128xf32> to vector<8xf32>
      %49 = vector.shape_cast %48 : vector<8xf32> to vector<8x1xf32>
      %50 = arith.addf %46, %49 : vector<8x1xf32>
      %51 = arith.mulf %9, %9 : vector<8x128xf32>
      %cst_29 = arith.constant dense<0.000000e+00> : vector<8xf32>
      %52 = vector.multi_reduction <add>, %51, %cst_29 [1] : vector<8x128xf32> to vector<8xf32>
      %53 = vector.shape_cast %52 : vector<8xf32> to vector<8x1xf32>
      %54 = arith.addf %50, %53 : vector<8x1xf32>
      %55 = arith.mulf %12, %12 : vector<8x128xf32>
      %cst_30 = arith.constant dense<0.000000e+00> : vector<8xf32>
      %56 = vector.multi_reduction <add>, %55, %cst_30 [1] : vector<8x128xf32> to vector<8xf32>
      %57 = vector.shape_cast %56 : vector<8xf32> to vector<8x1xf32>
      %58 = arith.addf %54, %57 : vector<8x1xf32>
      %c0_31 = arith.constant 0 : index
      %c0_32 = arith.constant 0 : index
      %59 = vector.load %arg7[%c0_31, %c0_32] : memref<8x1xf32, #tpu.memory_space<vmem>>, vector<8x1xf32>
      %60 = arith.addf %59, %41 : vector<8x1xf32>
      %c0_33 = arith.constant 0 : index
      %c0_34 = arith.constant 0 : index
      %61 = vector.load %arg7[%c0_33, %c0_34] : memref<8x1xf32, #tpu.memory_space<vmem>>, vector<8x1xf32>
      tpu.vector_store %arg7[%c0_33, %c0_34], %60 {strides = array<i32>} : memref<8x1xf32, #tpu.memory_space<vmem>>, vector<8x1xf32>,
      %c0_35 = arith.constant 0 : index
      %c0_36 = arith.constant 0 : index
      %62 = vector.load %arg8[%c0_35, %c0_36] : memref<8x1xf32, #tpu.memory_space<vmem>>, vector<8x1xf32>
      %63 = arith.addf %62, %58 : vector<8x1xf32>
      %c0_37 = arith.constant 0 : index
      %c0_38 = arith.constant 0 : index
      %64 = vector.load %arg8[%c0_37, %c0_38] : memref<8x1xf32, #tpu.memory_space<vmem>>, vector<8x1xf32>
      tpu.vector_store %arg8[%c0_37, %c0_38], %63 {strides = array<i32>} : memref<8x1xf32, #tpu.memory_space<vmem>>, vector<8x1xf32>,
      %cst_39 = arith.constant 0.000000e+00 : f32
      %65 = vector.broadcast %cst_39 : f32 to vector<8x128xf32>
      %c0_40 = arith.constant 0 : index
      %c0_41 = arith.constant 0 : index
      %66 = vector.load %arg6[%c0_40, %c0_41] : memref<8x128xf32, #tpu.memory_space<vmem>>, vector<8x128xf32>
      tpu.vector_store %arg6[%c0_40, %c0_41], %65 {strides = array<i32>} : memref<8x128xf32, #tpu.memory_space<vmem>>, vector<8x128xf32>,
    } else {
    }
    %c0_i32_17 = arith.constant 0 : i32
    %21 = arith.cmpi eq, %arg0, %c0_i32_17 : i32
    %c0_i32_18 = arith.constant 0 : i32
    %22 = arith.cmpi eq, %arg1, %c0_i32_18 : i32
    %23 = arith.andi %21, %22 : i1
    %24 = arith.extui %23 : i1 to i32
    %c0_i32_19 = arith.constant 0 : i32
    %25 = arith.cmpi ne, %24, %c0_i32_19 : i32
    scf.if %25 {
      %c0_21 = arith.constant 0 : index
      %c0_22 = arith.constant 0 : index
      %29 = vector.load %arg7[%c0_21, %c0_22] : memref<8x1xf32, #tpu.memory_space<vmem>>, vector<8x1xf32>
      %cst_23 = arith.constant 0.001953125 : f32
      %30 = vector.broadcast %cst_23 : f32 to vector<8x1xf32>
      %31 = arith.mulf %29, %30 : vector<8x1xf32>
      %c0_24 = arith.constant 0 : index
      %c0_25 = arith.constant 0 : index
      %32 = vector.load %arg8[%c0_24, %c0_25] : memref<8x1xf32, #tpu.memory_space<vmem>>, vector<8x1xf32>
      %cst_26 = arith.constant 0.001953125 : f32
      %33 = vector.broadcast %cst_26 : f32 to vector<8x1xf32>
      %34 = arith.mulf %32, %33 : vector<8x1xf32>
      %35 = arith.mulf %31, %31 : vector<8x1xf32>
      %36 = arith.subf %34, %35 : vector<8x1xf32>
      %cst_27 = arith.constant 9.99999974E-6 : f32
      %37 = vector.broadcast %cst_27 : f32 to vector<8x1xf32>
      %38 = arith.addf %36, %37 : vector<8x1xf32>
      %39 = math.rsqrt %38 : vector<8x1xf32>
      %c0_28 = arith.constant 0 : index
      %c0_29 = arith.constant 0 : index
      %40 = vector.load %arg4[%c0_28, %c0_29] : memref<8x1xf32, #tpu.memory_space<vmem>>, vector<8x1xf32>
      %41 = arith.mulf %39, %40 : vector<8x1xf32>
      %c0_30 = arith.constant 0 : index
      %c0_31 = arith.constant 0 : index
      %42 = vector.load %arg9[%c0_30, %c0_31] : memref<8x1xf32, #tpu.memory_space<vmem>>, vector<8x1xf32>
      tpu.vector_store %arg9[%c0_30, %c0_31], %41 {strides = array<i32>} : memref<8x1xf32, #tpu.memory_space<vmem>>, vector<8x1xf32>,
      %c0_32 = arith.constant 0 : index
      %c0_33 = arith.constant 0 : index
      %43 = vector.load %arg5[%c0_32, %c0_33] : memref<8x1xf32, #tpu.memory_space<vmem>>, vector<8x1xf32>
      %44 = arith.mulf %31, %41 : vector<8x1xf32>
      %45 = arith.subf %43, %44 : vector<8x1xf32>
      %c0_34 = arith.constant 0 : index
      %c0_35 = arith.constant 0 : index
      %46 = vector.load %arg10[%c0_34, %c0_35] : memref<8x1xf32, #tpu.memory_space<vmem>>, vector<8x1xf32>
      tpu.vector_store %arg10[%c0_34, %c0_35], %45 {strides = array<i32>} : memref<8x1xf32, #tpu.memory_space<vmem>>, vector<8x1xf32>,
    } else {
    }
    %c1_i32 = arith.constant 1 : i32
    %26 = arith.cmpi eq, %arg0, %c1_i32 : i32
    %27 = arith.extui %26 : i1 to i32
    %c0_i32_20 = arith.constant 0 : i32
    %28 = arith.cmpi ne, %27, %c0_i32_20 : i32
    scf.if %28 {
      %c0_21 = arith.constant 0 : index
      %c0_22 = arith.constant 0 : index
      %29 = vector.load %arg9[%c0_21, %c0_22] : memref<8x1xf32, #tpu.memory_space<vmem>>, vector<8x1xf32>
      %c0_23 = arith.constant 0 : index
      %c0_24 = arith.constant 0 : index
      %30 = vector.load %arg10[%c0_23, %c0_24] : memref<8x1xf32, #tpu.memory_space<vmem>>, vector<8x1xf32>
      %31 = vector.broadcast %29 : vector<8x1xf32> to vector<8x128xf32>
      %32 = arith.mulf %3, %31 : vector<8x128xf32>
      %33 = vector.broadcast %30 : vector<8x1xf32> to vector<8x128xf32>
      %34 = arith.addf %32, %33 : vector<8x128xf32>
      %cst_25 = arith.constant 0.000000e+00 : f32
      %35 = vector.broadcast %cst_25 : f32 to vector<8x128xf32>
      %36 = arith.maximumf %34, %35 : vector<8x128xf32>
      %37 = vector.broadcast %29 : vector<8x1xf32> to vector<8x128xf32>
      %38 = arith.mulf %6, %37 : vector<8x128xf32>
      %39 = vector.broadcast %30 : vector<8x1xf32> to vector<8x128xf32>
      %40 = arith.addf %38, %39 : vector<8x128xf32>
      %cst_26 = arith.constant 0.000000e+00 : f32
      %41 = vector.broadcast %cst_26 : f32 to vector<8x128xf32>
      %42 = arith.maximumf %40, %41 : vector<8x128xf32>
      %43 = vector.broadcast %29 : vector<8x1xf32> to vector<8x128xf32>
      %44 = arith.mulf %9, %43 : vector<8x128xf32>
      %45 = vector.broadcast %30 : vector<8x1xf32> to vector<8x128xf32>
      %46 = arith.addf %44, %45 : vector<8x128xf32>
      %cst_27 = arith.constant 0.000000e+00 : f32
      %47 = vector.broadcast %cst_27 : f32 to vector<8x128xf32>
      %48 = arith.maximumf %46, %47 : vector<8x128xf32>
      %49 = vector.broadcast %29 : vector<8x1xf32> to vector<8x128xf32>
      %50 = arith.mulf %12, %49 : vector<8x128xf32>
      %51 = vector.broadcast %30 : vector<8x1xf32> to vector<8x128xf32>
      %52 = arith.addf %50, %51 : vector<8x128xf32>
      %cst_28 = arith.constant 0.000000e+00 : f32
      %53 = vector.broadcast %cst_28 : f32 to vector<8x128xf32>
      %54 = arith.maximumf %52, %53 : vector<8x128xf32>
      %55 = arith.maximumf %36, %42 : vector<8x128xf32>
      %56 = arith.maximumf %48, %54 : vector<8x128xf32>
      %57 = arith.maximumf %55, %56 : vector<8x128xf32>
      %c0_29 = arith.constant 0 : index
      %c0_30 = arith.constant 0 : index
      %58 = vector.load %arg6[%c0_29, %c0_30] : memref<8x128xf32, #tpu.memory_space<vmem>>, vector<8x128xf32>
      tpu.vector_store %arg6[%c0_29, %c0_30], %57 {strides = array<i32>} : memref<8x128xf32, #tpu.memory_space<vmem>>, vector<8x128xf32>,
    } else {
    }
    return
  }
  func.func @transform_0(%arg0: i32, %arg1: i32) -> (i32, i32, i32) {
    %c0_i32 = arith.constant 0 : i32
    %c0_i32_0 = arith.constant 0 : i32
    %c0_i32_1 = arith.constant 0 : i32
    return %c0_i32, %c0_i32_0, %arg1 : i32, i32, i32
  }
  func.func @transform_1(%arg0: i32, %arg1: i32) -> (i32, i32) {
    %c0_i32 = arith.constant 0 : i32
    %c0_i32_0 = arith.constant 0 : i32
    %c0_i32_1 = arith.constant 0 : i32
    return %c0_i32, %c0_i32_0 : i32, i32
  }
  func.func @transform_2(%arg0: i32, %arg1: i32) -> (i32, i32) {
    %c0_i32 = arith.constant 0 : i32
    %c0_i32_0 = arith.constant 0 : i32
    %c0_i32_1 = arith.constant 0 : i32
    return %c0_i32, %c0_i32_0 : i32, i32
  }
  func.func @transform_3(%arg0: i32, %arg1: i32) -> (i32, i32) {
    %c0_i32 = arith.constant 0 : i32
    %c0_i32_0 = arith.constant 0 : i32
    %c0_i32_1 = arith.constant 0 : i32
    return %c0_i32, %c0_i32_0 : i32, i32
  }
  func.func @transform_4(%arg0: i32, %arg1: i32) -> (i32, i32) {
    %c0_i32 = arith.constant 0 : i32
    %c0_i32_0 = arith.constant 0 : i32
    return %c0_i32, %arg1 : i32, i32
  }
}

</mosaic_0001>

<bundles_post_ra>
// kernel: tpu_custom_call.1
= control target key start
LH: loop header
LB: loop body
LE: loop exit
PB: predicated region body
PF: predicated region fallthrough
CT: control target
= control target key end

     0   :  { %9 = vsyncpa [#allocation7], 0  ;;  %s1042_s0 = inlined_call_operand.hbm [shape: bf16[4,48,128], index: 0, kind: input, shape index: {}]   ;;  %s1043_s1 = inlined_call_operand.vmem [shape: bf16[8,48], index: 1, kind: input, shape index: {}]   ;;  %s1044_s2 = inlined_call_operand.vmem [shape: f32[8,1], index: 2, kind: input, shape index: {}]   ;;  %s1045_s3 = inlined_call_operand.vmem [shape: f32[8,1], index: 3, kind: input, shape index: {}]   ;;  %s1046_s4 = inlined_call_operand.hbm [shape: f32[8,128], index: 4, kind: output, shape index: {}]  }
   0x1   :  { %10 = vsyncpa [#allocation8], 0  ;;  %s896_s15 = smov 0   ;;  %s898_s16 = smov 0  }
   0x2   :  { %s900_s17 = smov 0  }
   0x3 LB: > { %s627_s18 = sadd.s32 4294967295, %s860_s17   ;;  %s28_s19 = sadd.s32 1, %s856_s16  ;;  %s860_s17 = sphi %s900_s17, %s16_s17   ;;  %s856_s16 = sphi %s898_s16, %s1057_s16   ;;  %s852_s15 = sphi %s896_s15, %s1056_s15  }
   0x4   : > { %p30_p0 = scmp.ge.s32.totalorder %s28_s19, 2  ;;  %p628_p1 = scmp.ge.s32.totalorder %s860_s17, 1 }
   0x5   : > { %p148_p2 = scmp.lt.s32.totalorder %s860_s17, 3  ;;  %p923_p4 = scmp.eq.s32.totalorder %s627_s18, 0 }
   0x6   : > { %s1059_s19 = smov (%p30_p0, %s28_s19), 0  ;;  %s862_s22 = smov [#allocation6]  }
   0x7   : > { %p917_p3 = pnand %p628_p1, %p148_p2  ;;  %s162_s23 = sshll.u32 %s862_s22, 4  ;;  %s163_s23 = int_to_ptr.vmem [resolvable:$true] %s162_s23 }
   0x8   : > { %s1051_s21 = scalar_select %p923_p4, 1, 0 }
   0x9   : > { %s1050_s20 = scalar_select %p917_p3, 1, 0 }
   0xa   : > { %p720_p5 = pneg %p917_p3  ;;  %s776_s27 = scalar_lea.hbm %s1042_s0, 1536 }
   0xb   : > { %p777_p7 = scmp.ne.s32.totalorder %s1042_s0, %s776_s27  ;;  %p783_p11 = scmp.lt.u32.totalorder %s776_s27, %s1042_s0 }
   0xc   : > { %p931_p6 = pnand %p923_p4, %p720_p5 }
   0xe   : > { %p778_p8 = pneg %p931_p6 }
  0x10   : > { %p779_p9 = pnand %p778_p8, %p777_p7 }
  0x12   : > { %p780_p10 = pneg %p779_p9 }
  0x14   : > { %p785_p12 = pnand %p783_p11, %p780_p10 }
  0x16   : > { %788 = shalt.err (!%p785_p12)
}
  0x17   : > { %s789_s6 = scalar_lea.vmem %s163_s23, 1536  ;;  %p797_p2 = scmp.lt.s32.totalorder %s163_s23, %s163_s23 }
  0x18   : > { %p790_p13 = scmp.ne.s32.totalorder %s163_s23, %s789_s6  ;;  %p798_p5 = scmp.lt.s32.totalorder %s789_s6, %s789_s6 }
  0x1a   : > { %p792_p0 = pnand %p790_p13, %p778_p8  ;;  %p799_p4 = por %p798_p5, %p797_p2 }
  0x1c   : > { %p793_p1 = pneg %p792_p0 }
  0x1e   : > { %p800_p3 = pnand %p799_p4, %p793_p1 }
  0x20   : > { %803 = shalt.err (!%p800_p3)
}
  0x21   : > { %s863_s7 = smov 64   ;;  %s864_s8 = smov 4  }
  0x22   : > { %723 = dma.hbm_to_vmem [thread:$0]  (!%p931_p6), %s1042_s0, 1536, %s163_s23, [#allocation7], %s863_s7, %s863_s7, %s864_s8  }
  0x23   : > { %p1053_p7 = scmp.ne.s32.totalorder %s1050_s20, 0 }
  0x24   : > { %p1054_p9 = scmp.ne.s32.totalorder (!%p1053_p7), %s1051_s21, 0 }
  0x25   : > { %187 = sbr.rel (%p1053_p7) target bundleno = 648 (0x288), region = 36 }
  0x2c   : > { %843 = dma.done.wait (%p1054_p9), [#allocation7], 1536  }
  0x2d   : > { %845 = vsyncadd (%p1054_p9), [#allocation7], 4294965760  ;;  %v865_v0 = vmov 0.0   ;;  %vm866_vm0 = vmmov 0   ;;  %v761_v1 = vld [vmem:[#allocation6] sm:$0xff]   ;;  %v762_v2 = vld [vmem:[#allocation6 + $0x18] sm:$0xff]  }
  0x2e   : > { %672 = vmatprep.subr.bf16.mxu0 %v865_v0  ;;  %682 = vmatprep.subr.bf16.mxu1 %v865_v0  ;;  %v763_v3 = vld [vmem:[#allocation6 + $0x8] sm:$0xff]   ;;  %v764_v4 = vld [vmem:[#allocation6 + $0x20] sm:$0xff]   ;;  %v765_v5 = vld [vmem:[#allocation6 + $0x10] sm:$0xff]   ;;  %vm229_vm1 = vcmask 392192   ;;  %p468_p3 = scmp.eq.s32.totalorder %s852_s15, 0 }
  0x2f   : > { %678 = vmatprep.mubr.msk.bf16.mxu0 %vm866_vm0, %v865_v0  ;;  %688 = vmatprep.mubr.msk.bf16.mxu1 %vm866_vm0, %v865_v0  ;;  %v766_v6 = vld [vmem:[#allocation6 + $0x28] sm:$0xff]   ;;  %v204_v7 = vld [vmem:[%s1043_s1] sm:$0xf]  ;;  %v767_v8 = vld [vmem:[#allocation6 + $0x30] sm:$0xff]   ;;  %vm474_vm2 = vcmask (%p468_p3), 7168   ;;  %v867_v30 = vmov (%p468_p3), 0.0  }
  0x30   : > { %673 = vmatpush3.bf16.msra.mxu0 %v761_v1  ;;  %683 = vmatpush3.bf16.msra.mxu1 %v762_v2  ;;  %v768_v9 = vld [vmem:[#allocation6 + $0x48] sm:$0xff]   ;;  %v769_v10 = vld [vmem:[#allocation6 + $0x38] sm:$0xff]   ;;  %v770_v11 = vld [vmem:[#allocation6 + $0x50] sm:$0xff]   ;;  %475 = vst.msk [vmem:[#allocation2] sm:$0xff] (%p468_p3), %vm474_vm2, %v867_v30 }
  0x31   : > { %674 = vmatprep.subr.bf16.mxu0 %v865_v0  ;;  %684 = vmatprep.subr.bf16.mxu1 %v865_v0  ;;  %v771_v12 = vld [vmem:[#allocation6 + $0x40] sm:$0xff]   ;;  %v772_v13 = vld [vmem:[#allocation6 + $0x58] sm:$0xff]   ;;  %476 = vst.msk [vmem:[#allocation3] sm:$0xff] (%p468_p3), %vm474_vm2, %v867_v30 }
  0x34   : > { %675 = vmatpush3.bf16.msra.mxu0 %v763_v3  ;;  %685 = vmatpush3.bf16.msra.mxu1 %v764_v4 }
  0x35   : > { %676 = vmatprep.subr.bf16.mxu0 %v865_v0  ;;  %686 = vmatprep.subr.bf16.mxu1 %v865_v0 }
  0x38   : > { %677 = vmatpush3.bf16.msra.mxu0 %v765_v5  ;;  %687 = vmatpush3.bf16.msra.mxu1 %v766_v6 }
  0x39   : > { %692 = vmatprep.subr.bf16.mxu0 %v865_v0  ;;  %702 = vmatprep.subr.bf16.mxu1 %v865_v0 }
  0x3b   : > { %679 = vmatmul.mubr.msk.bf16.vlgmr.msra.gmra.mrb[0].mxu0 %vm229_vm1, %v204_v7  ;;  %689 = vmatmul.mubr.msk.bf16.vlgmr.msra.gmra.mrb[0].mxu1 %vm229_vm1, %v204_v7 }
  0x3c   : > { %693 = vmatpush3.bf16.msra.mxu0 %v767_v8  ;;  %703 = vmatpush3.bf16.msra.mxu1 %v768_v9 }
  0x3d   : > { %694 = vmatprep.subr.bf16.mxu0 %v865_v0  ;;  %704 = vmatprep.subr.bf16.mxu1 %v865_v0 }
  0x3e   : > { %698 = vmatprep.mubr.msk.bf16.mxu0 %vm866_vm0, %v865_v0  ;;  %708 = vmatprep.mubr.msk.bf16.mxu1 %vm866_vm0, %v865_v0 }
  0x40   : > { %695 = vmatpush3.bf16.msra.mxu0 %v769_v10  ;;  %705 = vmatpush3.bf16.msra.mxu1 %v770_v11 }
  0x41   : > { %696 = vmatprep.subr.bf16.mxu0 %v865_v0  ;;  %706 = vmatprep.subr.bf16.mxu1 %v865_v0 }
  0x44   : > { %697 = vmatpush3.bf16.msra.mxu0 %v771_v12  ;;  %707 = vmatpush3.bf16.msra.mxu1 %v772_v13 }
  0x47   : > { %699 = vmatmul.mubr.msk.bf16.vlgmr.msra.gmra.mrb[4].mxu0 %vm229_vm1, %v204_v7  ;;  %709 = vmatmul.mubr.msk.bf16.vlgmr.msra.gmra.mrb[4].mxu1 %vm229_vm1, %v204_v7 }
 0x10e   : > { %v969_v14 = vpop.f32.mrb[0].mxu0  ;;  %v971_v15 = vpop.f32.mrb[0].mxu1 }
 0x10f   : > { %v680_v16 = vpop.f32.mrb[1].mxu0  ;;  %v690_v17 = vpop.f32.mrb[1].mxu1 }
 0x110   : > { %v270_v18 = vpop.f32.mrb[2].mxu0  ;;  %v335_v19 = vpop.f32.mrb[2].mxu1 }
 0x111   : > { %v681_v20 = vpop.f32.mrb[3].mxu0  ;;  %v691_v21 = vpop.f32.mrb[3].mxu1 }
 0x117   : > { %473 = sbr.rel (!%p468_p3) target bundleno = 286 (0x11e), region = 44 }
 0x11a   : > { %v973_v22 = vpop.f32.mrb[4].mxu0  ;;  %v975_v23 = vpop.f32.mrb[4].mxu1 }
 0x11b   : > { %v700_v24 = vpop.f32.mrb[5].mxu0  ;;  %v710_v25 = vpop.f32.mrb[5].mxu1 }
 0x11c   : > { %v400_v26 = vpop.f32.mrb[6].mxu0  ;;  %v465_v27 = vpop.f32.mrb[6].mxu1 }
 0x11d   : > { %v701_v28 = vpop.f32.mrb[7].mxu0  ;;  %v711_v29 = vpop.f32.mrb[7].mxu1 }
 0x11e PF: > { %p649_p4 = scmp.ne.s32.totalorder %s852_s15, 0 }
 0x11f   : > { %480 = vadd.xlane.f32.xlu0 (!%p649_p4), %v969_v14  ;;  %v492_v31 = vmul.f32 (!%p649_p4), %v969_v14, %v969_v14  ;;  %v496_v32 = vmul.f32 (!%p649_p4), %v971_v15, %v971_v15  ;;  %v500_v33 = vmul.f32 (!%p649_p4), %v973_v22, %v973_v22  ;;  %v504_v34 = vmul.f32 (!%p649_p4), %v975_v23, %v975_v23  ;;  %v508_v46 = vld [vmem:[#allocation2] sm:$0xff] (!%p649_p4)  ;;  %v512_v49 = vld [vmem:[#allocation3] sm:$0xff] (!%p649_p4) }
 0x120   : > { %479 = sbr.rel (%p649_p4) target bundleno = 448 (0x1c0), region = 48  ;;  %v868_v35 = vmov (!%p649_p4), 0.0   ;;  %vm510_vm3 = vcmask (!%p649_p4), 7168  }
 0x121   : > { %493 = vadd.xlane.f32.xlu1 (!%p649_p4), %v492_v31  ;;  %515 = vst [vmem:[#allocation9] sm:$0xff] (!%p649_p4), %v868_v35 }
 0x123   : > { %483 = vadd.xlane.f32.xlu0 (!%p649_p4), %v971_v15 }
 0x125   : > { %497 = vadd.xlane.f32.xlu1 (!%p649_p4), %v496_v32 }
 0x127   : > { %486 = vadd.xlane.f32.xlu0 %v973_v22 }
 0x129   : > { %501 = vadd.xlane.f32.xlu1 %v500_v33 }
 0x12b   : > { %489 = vadd.xlane.f32.xlu0 %v975_v23 }
 0x12d   : > { %505 = vadd.xlane.f32.xlu1 %v504_v34 }
 0x1ac   : > { %v481_v36 = vpop.xlane.xlu0 %480 }
 0x1ae   : > { %v494_v37 = vpop.xlane.xlu1 %493 }
 0x1b0   : > { %v484_v38 = vpop.xlane.xlu0 %483 }
 0x1b1   : > { %v485_v41 = vadd.f32 %v484_v38, %v481_v36 }
 0x1b2   : > { %v498_v39 = vpop.xlane.xlu1 %497 }
 0x1b3   : > { %v499_v43 = vadd.f32 %v498_v39, %v494_v37 }
 0x1b4   : > { %v487_v40 = vpop.xlane.xlu0 %486 }
 0x1b5   : > { %v488_v44 = vadd.f32 %v487_v40, %v485_v41 }
 0x1b6   : > { %v502_v42 = vpop.xlane.xlu1 %501 }
 0x1b7   : > { %v503_v47 = vadd.f32 %v502_v42, %v499_v43 }
 0x1b8   : > { %v490_v45 = vpop.xlane.xlu0 %489 }
 0x1b9   : > { %v491_v48 = vadd.f32 %v490_v45, %v488_v44 }
 0x1ba   : > { %v506_v50 = vpop.xlane.xlu1 %505 }
 0x1bb   : > { %v509_v51 = vadd.f32 %v508_v46, %v491_v48  ;;  %v507_v52 = vadd.f32 %v506_v50, %v503_v47 }
 0x1bd   : > { %511 = vst.msk [vmem:[#allocation2] sm:$0xff] %vm510_vm3, %v509_v51  ;;  %v513_v53 = vadd.f32 %v512_v49, %v507_v52 }
 0x1bf   : > { %514 = vst.msk [vmem:[#allocation3] sm:$0xff] %vm510_vm3, %v513_v53 }
 0x1c0 PF: > { %517 = sbr.rel (!%p468_p3) target bundleno = 479 (0x1df), region = 52  ;;  %v526_v61 = vld [vmem:[%s1044_s2] sm:$0xff] (%p468_p3)  ;;  %vm528_vm4 = vcmask (%p468_p3), 7168  }
 0x1c1   : > { %v530_v0 = vld [vmem:[%s1045_s3] sm:$0xff] (%p468_p3) }
 0x1c4   : > { %v518_v54 = vld [vmem:[#allocation2] sm:$0xff] (%p468_p3) }
 0x1c5   : > { %v519_v56 = vmul.f32 (%p468_p3), 0.001953125, %v518_v54 }
 0x1c6   : > { %v520_v55 = vld [vmem:[#allocation3] sm:$0xff] (%p468_p3) }
 0x1c7   : > { %v521_v57 = vmul.f32 0.001953125, %v520_v55  ;;  %v522_v58 = vmul.f32 %v519_v56, %v519_v56 }
 0x1c9   : > { %v523_v59 = vsub.f32 %v521_v57, %v522_v58 }
 0x1cb   : > { %v524_v60 = vadd.f32 1e-05, %v523_v59 }
 0x1cd   : > { %773 = vrsqrt.f32 %v524_v60 }
 0x1d7   : > { %v774_v62 = vpop.eup %773 }
 0x1d8   : > { %v527_v63 = vmul.f32 %v774_v62, %v526_v61 }
 0x1da   : > { %529 = vst.msk [vmem:[#allocation4] sm:$0xff] %vm528_vm4, %v527_v63  ;;  %v531_v1 = vmul.f32 %v527_v63, %v519_v56 }
 0x1dc   : > { %v532_v2 = vsub.f32 %v530_v0, %v531_v1 }
 0x1de   : > { %533 = vst.msk [vmem:[#allocation5] sm:$0xff] %vm528_vm4, %v532_v2 }
 0x1df PF: > { %p650_p6 = scmp.ne.s32.totalorder %s852_s15, 1 }
 0x1e0   : > { %v869_v4 = vmov (!%p650_p6), 0  }
 0x1e1   : > { %537 = sbr.rel (%p650_p6) target bundleno = 623 (0x26f), region = 56  ;;  %v538_v3 = vld [vmem:[#allocation4] sm:$0xff] (!%p650_p6)  ;;  %775 = vset.pattern.permute.xlu0 (!%p650_p6), %v869_v4 }
 0x1e2   : > { %542 = vperm.xlu0 (!%p650_p6), %775, %v538_v3  }
 0x1e5   : > { %v539_v5 = vld [vmem:[#allocation5] sm:$0xff] (!%p650_p6) }
 0x1e6   : > { %548 = vperm.xlu0 (!%p650_p6), %775, %v539_v5  }
 0x261   : > { %v543_v6 = vpop.permute.xlu0 %542 }
 0x262   : > { %v545_v7 = vmul.f32 %v543_v6, %v969_v14  ;;  %v553_v8 = vmul.f32 %v543_v6, %v971_v15  ;;  %v556_v9 = vmul.f32 %v543_v6, %v973_v22  ;;  %v559_v10 = vmul.f32 %v543_v6, %v975_v23 }
 0x265   : > { %v549_v11 = vpop.permute.xlu0 %548 }
 0x266   : > { %v551_v12 = vadd.f32 %v549_v11, %v545_v7  ;;  %v554_v13 = vadd.f32 %v553_v8, %v549_v11  ;;  %v557_v16 = vadd.f32 %v556_v9, %v549_v11  ;;  %v560_v17 = vadd.f32 %v559_v10, %v549_v11 }
 0x268   : > { %v552_v18 = vmax.f32 %v551_v12, 0.0  ;;  %v555_v19 = vmax.f32 %v554_v13, 0.0  ;;  %v558_v20 = vmax.f32 %v557_v16, 0.0  ;;  %v561_v21 = vmax.f32 %v560_v17, 0.0 }
 0x26a   : > { %v562_v24 = vmax.f32 %v552_v18, %v555_v19  ;;  %v563_v25 = vmax.f32 %v558_v20, %v561_v21 }
 0x26c   : > { %v564_v26 = vmax.f32 %v562_v24, %v563_v25 }
 0x26e   : > { %565 = vst [vmem:[#allocation9] sm:$0xff] %v564_v26 }
 0x26f PF: > { %p1007_p8 = scmp.eq.s32.totalorder %s627_s18, 1  ;;  %s870_s22 = smov [#allocation9]  }
 0x270   : > { %s575_s23 = sshll.u32 %s870_s22, 4  ;;  %s576_s23 = int_to_ptr.vmem [resolvable:$true] %s575_s23 }
 0x271   : > { %s804_s24 = scalar_lea.vmem %s576_s23, 128  ;;  %p811_p13 = scmp.lt.s32.totalorder %s576_s23, %s576_s23 }
 0x272   : > { %p805_p10 = scmp.ne.s32.totalorder %s576_s23, %s804_s24  ;;  %p812_p0 = scmp.lt.s32.totalorder %s804_s24, %s804_s24 }
 0x274   : > { %p806_p11 = pnand %p805_p10, %p1007_p8  ;;  %p813_p1 = por %p812_p0, %p811_p13 }
 0x276   : > { %p807_p12 = pneg %p806_p11 }
 0x278   : > { %p814_p2 = pnand %p813_p1, %p807_p12 }
 0x27a   : > { %817 = shalt.err (!%p814_p2)
}
 0x27b   : > { %s818_s18 = scalar_lea.hbm %s1046_s4, 128 }
 0x27c   : > { %p819_p5 = scmp.ne.s32.totalorder %s1046_s4, %s818_s18  ;;  %p824_p3 = scmp.lt.u32.totalorder %s818_s18, %s1046_s4 }
 0x27e   : > { %p820_p7 = pnand %p819_p5, %p1007_p8 }
 0x280   : > { %p821_p9 = pneg %p820_p7 }
 0x282   : > { %p826_p4 = pnand %p824_p3, %p821_p9 }
 0x284   : > { %829 = shalt.err (!%p826_p4)
}
 0x285   : > { %717 = dma.vmem_to_hbm [thread:$0]  (%p1007_p8), %s576_s23, 128, %s1046_s4, [#allocation8]  }
 0x286   : > { %847 = dma.done.wait (%p1007_p8), [#allocation8], 128  }
 0x287   : > { %849 = vsyncadd (%p1007_p8), [#allocation8], 4294967168 }
 0x288 PF: > { %s16_s17 = sadd.s32 1, %s860_s17   ;;  %s1056_s15 = smov %s856_s16 }
 0x289   : > { %p13_p6 = scmp.ge.s32.totalorder %s16_s17, 4   ;;  %s1057_s16 = smov %s1059_s19 }
 0x28b   :  { %15 = sbr.rel (!%p13_p6) target bundleno = 3 (0x3), region = 86 }
 0x292   :  { %588 = vsyncpa [#allocation7], 1 }
 0x293   :  { %590 = vsyncpa [#allocation7 + $0x1], 1 }
 0x294   :  { %591 = vsyncpa [#allocation8], 1 }
 0x295   :  { %593 = vsyncpa [#allocation8 + $0x1], 1 }

</bundles_post_ra>
